<compile_context>
chip_gen: v7x
topology: tpu7x:2x2x1
jax: 0.10.0
libtpu: 0.0.40
codegen_flags: <defaults>
</compile_context>

<pallas_src>
import functools

import jax
import jax.numpy as jnp
from jax.experimental import pallas as pl
from jax.experimental.pallas import tpu as pltpu

LANES = 128
MAX_BLOCK_ROWS = 2048  # 1 MiB f32 per input block


def _vp_loss_kernel(y_ref, x1_ref, t_ref, o_ref, acc_ref, *,
                    block_rows, m_rows, steps_per_core, vp_penalty, needs_mask):
    c = pl.program_id(0)          # "core" (parallel) axis
    s = pl.program_id(1)          # reduction steps within a core

    @pl.when(s == 0)
    def _init():
        acc_ref[...] = jnp.zeros_like(acc_ref)

    # Cast only inside the kernel so bf16 inputs stay half-width in HBM.
    y = y_ref[...].astype(jnp.float32)
    x1 = x1_ref[...].astype(jnp.float32)
    t = t_ref[...].astype(jnp.float32)

    dy = y - t
    dx = x1 - t
    contrib = dy * dy + jnp.float32(vp_penalty) * (dx * dx)

    if needs_mask:
        # Logical (unclamped) block index -> global row ids; rows >= m_rows are
        # either edge-padding garbage or duplicated (clamped) blocks -> zeroed.
        b = c * steps_per_core + s
        rows = b * block_rows + jax.lax.broadcasted_iota(
            jnp.int32, (block_rows, LANES), 0)
        contrib = jnp.where(rows < m_rows, contrib, 0.0)

    # Fold the block's rows into the (8,128) vector accumulator: pure VPU adds
    # (the (n,8,128) reshape matches the native f32 vreg tiling).
    acc_ref[...] += contrib.reshape(block_rows // 8, 8, LANES).sum(axis=0)

    @pl.when(s == pl.num_programs(1) - 1)
    def _finalize():
        o_ref[...] = acc_ref[...].reshape(1, 8, LANES)


def _as_rows(a):
    """Lane-dense (M, 128) view of a tensor. No copy when size % 128 == 0."""
    flat = a.reshape(-1)
    rem = flat.shape[0] % LANES
    if rem:
        flat = jnp.pad(flat, (0, LANES - rem))  # rare ragged-lane fallback
    return flat.reshape(-1, LANES)


def vp_loss(outputs, target, vp_penalty=None):
    """Pallas implementation of VPLoss with criterion = MSE (mean reduction)."""
    if vp_penalty is None:
        vp_penalty = 0.5
    y, x1 = outputs
    assert y.shape == x1.shape == target.shape, "shapes must match"
    n_elems = int(y.size)

    y2 = _as_rows(y)
    x2 = _as_rows(x1)
    t2 = _as_rows(target)
    m_rows = y2.shape[0]

    block_rows = min(MAX_BLOCK_ROWS, ((m_rows + 7) // 8) * 8)
    num_blocks = pl.cdiv(m_rows, block_rows)
    n_cores = 2                                  # two partials (v7x megacore)
    steps_per_core = pl.cdiv(num_blocks, n_cores)
    # Mask only needed if the (core, step) sweep covers more rows than exist.
    needs_mask = (n_cores * steps_per_core * block_rows != m_rows)

    def in_map(c, s):
        # Clamp so duplicated / out-of-range logical blocks stay in bounds;
        # their contribution is zeroed by the in-kernel row mask.
        return (jnp.minimum(c * steps_per_core + s, num_blocks - 1), 0)

    kernel = functools.partial(
        _vp_loss_kernel,
        block_rows=block_rows,
        m_rows=m_rows,
        steps_per_core=steps_per_core,
        vp_penalty=float(vp_penalty),
        needs_mask=needs_mask,
    )

    in_spec = pl.BlockSpec((block_rows, LANES), in_map)
    partials = pl.pallas_call(
        kernel,
        out_shape=jax.ShapeDtypeStruct((n_cores, 8, LANES), jnp.float32),
        grid_spec=pltpu.PrefetchScalarGridSpec(
            num_scalar_prefetch=0,
            grid=(n_cores, steps_per_core),
            in_specs=[in_spec, in_spec, in_spec],
            out_specs=pl.BlockSpec((1, 8, LANES), lambda c, s: (c, 0, 0)),
            scratch_shapes=[pltpu.VMEM((8, LANES), jnp.float32)],
        ),
        compiler_params=pltpu.CompilerParams(
            dimension_semantics=("parallel", "arbitrary")
        ),
    )(y2, x2, t2)

    # Tiny final combine: sum of per-core lane partials / true element count.
    # Note: f32 lane-wise accumulation; fine for the tested sizes (drift only a
    # concern for >~1e8 elements per lane).
    return jnp.sum(partials) / jnp.float32(n_elems)


def _reference(outputs, target, vp_penalty=0.5):
    y, x1 = outputs
    mse = lambda a, b: jnp.mean((a.astype(jnp.float32) - b.astype(jnp.float32)) ** 2)
    return mse(y, target) + vp_penalty * mse(x1, target)


if __name__ == "__main__":
    key = jax.random.PRNGKey(0)
    k1, k2, k3 = jax.random.split(key, 3)
    # Small NCHW-shaped network outputs / target.
    shape = (2, 4, 16, 16)
    y = jax.random.normal(k1, shape, dtype=jnp.float32)
    x1 = jax.random.normal(k2, shape, dtype=jnp.float32)
    target = jax.random.normal(k3, shape, dtype=jnp.float32)

    loss = vp_loss((y, x1), target, vp_penalty=None)  # None -> default 0.5
    loss = jax.block_until_ready(loss)

    ref = _reference((y, x1), target, vp_penalty=0.5)
    assert jnp.allclose(loss, ref, rtol=1e-5, atol=1e-5), (loss, ref)
    print("KERNEL_OK")
</pallas_src>

<mosaic_0001>
module attributes {stable_mosaic.version = 11 : i64} {
  func.func @_vp_loss_kernel(%arg0: i32, %arg1: i32, %arg2: memref<16x128xf32, #tpu.memory_space<vmem>>, %arg3: memref<16x128xf32, #tpu.memory_space<vmem>>, %arg4: memref<16x128xf32, #tpu.memory_space<vmem>>, %arg5: memref<1x8x128xf32, #tpu.memory_space<vmem>>, %arg6: memref<8x128xf32, #tpu.memory_space<vmem>>) attributes {dimension_semantics = [#tpu.dimension_semantics<parallel>, #tpu.dimension_semantics<arbitrary>], iteration_bounds = array<i64: 2, 1>, scalar_prefetch = 0 : i64, scratch_operands = 1 : i64, tpu.core_type = #tpu.core_type<tc>, window_params = [{transform_indices = @transform_0, window_bounds = array<i64: 16, 128>}, {transform_indices = @transform_1, window_bounds = array<i64: 16, 128>}, {transform_indices = @transform_2, window_bounds = array<i64: 16, 128>}, {transform_indices = @transform_3, window_bounds = array<i64: 1, 8, 128>}]} {
    %c0_i32 = arith.constant 0 : i32
    %0 = arith.cmpi eq, %arg1, %c0_i32 : i32
    %1 = arith.extui %0 : i1 to i32
    %c0_i32_0 = arith.constant 0 : i32
    %2 = arith.cmpi ne, %1, %c0_i32_0 : i32
    scf.if %2 {
      %cst_15 = arith.constant 0.000000e+00 : f32
      %31 = vector.broadcast %cst_15 : f32 to vector<8x128xf32>
      %c0_16 = arith.constant 0 : index
      %c0_17 = arith.constant 0 : index
      %32 = vector.load %arg6[%c0_16, %c0_17] : memref<8x128xf32, #tpu.memory_space<vmem>>, vector<8x128xf32>
      tpu.vector_store %arg6[%c0_16, %c0_17], %31 {strides = array<i32>} : memref<8x128xf32, #tpu.memory_space<vmem>>, vector<8x128xf32>,
    } else {
    }
    %c0 = arith.constant 0 : index
    %c0_1 = arith.constant 0 : index
    %3 = vector.load %arg2[%c0, %c0_1] : memref<16x128xf32, #tpu.memory_space<vmem>>, vector<16x128xf32>
    %c0_2 = arith.constant 0 : index
    %c0_3 = arith.constant 0 : index
    %4 = vector.load %arg3[%c0_2, %c0_3] : memref<16x128xf32, #tpu.memory_space<vmem>>, vector<16x128xf32>
    %c0_4 = arith.constant 0 : index
    %c0_5 = arith.constant 0 : index
    %5 = vector.load %arg4[%c0_4, %c0_5] : memref<16x128xf32, #tpu.memory_space<vmem>>, vector<16x128xf32>
    %6 = arith.subf %3, %5 : vector<16x128xf32>
    %7 = arith.subf %4, %5 : vector<16x128xf32>
    %8 = arith.mulf %6, %6 : vector<16x128xf32>
    %9 = arith.mulf %7, %7 : vector<16x128xf32>
    %cst = arith.constant 5.000000e-01 : f32
    %10 = vector.broadcast %cst : f32 to vector<16x128xf32>
    %11 = arith.mulf %10, %9 : vector<16x128xf32>
    %12 = arith.addf %8, %11 : vector<16x128xf32>
    %c1_i32 = arith.constant 1 : i32
    %13 = arith.muli %arg0, %c1_i32 : i32
    %14 = arith.addi %13, %arg1 : i32
    %c16_i32 = arith.constant 16 : i32
    %15 = arith.muli %14, %c16_i32 : i32
    %16 = tpu.iota {dimensions = array<i32: 0>} : vector<16x128xi32>
    %17 = vector.broadcast %15 : i32 to vector<16x128xi32>
    %18 = arith.addi %17, %16 : vector<16x128xi32>
    %c16_i32_6 = arith.constant 16 : i32
    %19 = vector.broadcast %c16_i32_6 : i32 to vector<16x128xi32>
    %20 = arith.cmpi slt, %18, %19 : vector<16x128xi32>
    %cst_7 = arith.constant 0.000000e+00 : f32
    %21 = vector.broadcast %cst_7 : f32 to vector<16x128xf32>
    %22 = arith.select %20, %12, %21 : vector<16x128xi1>, vector<16x128xf32>
    %c0_8 = arith.constant 0 : index
    %c0_9 = arith.constant 0 : index
    %23 = vector.load %arg6[%c0_8, %c0_9] : memref<8x128xf32, #tpu.memory_space<vmem>>, vector<8x128xf32>
    %24 = vector.shape_cast %22 : vector<16x128xf32> to vector<2x8x128xf32>
    %cst_10 = arith.constant dense<0.000000e+00> : vector<8x128xf32>
    %25 = vector.multi_reduction <add>, %24, %cst_10 [0] : vector<2x8x128xf32> to vector<8x128xf32>
    %26 = arith.addf %23, %25 : vector<8x128xf32>
    %c0_11 = arith.constant 0 : index
    %c0_12 = arith.constant 0 : index
    %27 = vector.load %arg6[%c0_11, %c0_12] : memref<8x128xf32, #tpu.memory_space<vmem>>, vector<8x128xf32>
    tpu.vector_store %arg6[%c0_11, %c0_12], %26 {strides = array<i32>} : memref<8x128xf32, #tpu.memory_space<vmem>>, vector<8x128xf32>,
    %c0_i32_13 = arith.constant 0 : i32
    %28 = arith.cmpi eq, %arg1, %c0_i32_13 : i32
    %29 = arith.extui %28 : i1 to i32
    %c0_i32_14 = arith.constant 0 : i32
    %30 = arith.cmpi ne, %29, %c0_i32_14 : i32
    scf.if %30 {
      %c0_15 = arith.constant 0 : index
      %c0_16 = arith.constant 0 : index
      %31 = vector.load %arg6[%c0_15, %c0_16] : memref<8x128xf32, #tpu.memory_space<vmem>>, vector<8x128xf32>
      %32 = vector.shape_cast %31 : vector<8x128xf32> to vector<1x8x128xf32>
      %c0_17 = arith.constant 0 : index
      %c0_18 = arith.constant 0 : index
      %c0_19 = arith.constant 0 : index
      %33 = vector.load %arg5[%c0_17, %c0_18, %c0_19] : memref<1x8x128xf32, #tpu.memory_space<vmem>>, vector<1x8x128xf32>
      tpu.vector_store %arg5[%c0_17, %c0_18, %c0_19], %32 {strides = array<i32>} : memref<1x8x128xf32, #tpu.memory_space<vmem>>, vector<1x8x128xf32>,
    } else {
    }
    return
  }
  func.func @transform_0(%arg0: i32, %arg1: i32) -> (i32, i32) {
    %c1_i32 = arith.constant 1 : i32
    %0 = arith.muli %arg0, %c1_i32 : i32
    %1 = arith.addi %0, %arg1 : i32
    %c0_i32 = arith.constant 0 : i32
    %2 = arith.minsi %1, %c0_i32 : i32
    %c0_i32_0 = arith.constant 0 : i32
    %c0_i32_1 = arith.constant 0 : i32
    return %2, %c0_i32_0 : i32, i32
  }
  func.func @transform_1(%arg0: i32, %arg1: i32) -> (i32, i32) {
    %c1_i32 = arith.constant 1 : i32
    %0 = arith.muli %arg0, %c1_i32 : i32
    %1 = arith.addi %0, %arg1 : i32
    %c0_i32 = arith.constant 0 : i32
    %2 = arith.minsi %1, %c0_i32 : i32
    %c0_i32_0 = arith.constant 0 : i32
    %c0_i32_1 = arith.constant 0 : i32
    return %2, %c0_i32_0 : i32, i32
  }
  func.func @transform_2(%arg0: i32, %arg1: i32) -> (i32, i32) {
    %c1_i32 = arith.constant 1 : i32
    %0 = arith.muli %arg0, %c1_i32 : i32
    %1 = arith.addi %0, %arg1 : i32
    %c0_i32 = arith.constant 0 : i32
    %2 = arith.minsi %1, %c0_i32 : i32
    %c0_i32_0 = arith.constant 0 : i32
    %c0_i32_1 = arith.constant 0 : i32
    return %2, %c0_i32_0 : i32, i32
  }
  func.func @transform_3(%arg0: i32, %arg1: i32) -> (i32, i32, i32) {
    %c0_i32 = arith.constant 0 : i32
    %c0_i32_0 = arith.constant 0 : i32
    %c0_i32_1 = arith.constant 0 : i32
    return %arg0, %c0_i32, %c0_i32_0 : i32, i32, i32
  }
}

</mosaic_0001>

<bundles_post_ra>
// kernel: tpu_custom_call.1
= control target key start
LH: loop header
LB: loop body
LE: loop exit
PB: predicated region body
PF: predicated region fallthrough
CT: control target
= control target key end

     0   :  { %s1094_s0 = inlined_call_operand.hbm [shape: f32[16,128], index: 0, kind: input, shape index: {}]   ;;  %s1095_s1 = inlined_call_operand.hbm [shape: f32[16,128], index: 1, kind: input, shape index: {}]   ;;  %s1096_s2 = inlined_call_operand.hbm [shape: f32[16,128], index: 2, kind: input, shape index: {}]   ;;  %s1097_s3 = inlined_call_operand.hbm [shape: f32[2,8,128], index: 3, kind: output, shape index: {}]  }
   0x1   :  { %1104 = sst [smem:[#allocation16_spill]] %s1095_s1 }
   0x2   :  { %8 = vsyncpa [#allocation4], 0 }
   0x3   :  { %10 = vsyncpa [#allocation4 + $0x1], 0 }
   0x4   :  { %11 = vsyncpa [#allocation7], 0 }
   0x5   :  { %13 = vsyncpa [#allocation7 + $0x1], 0 }
   0x6   :  { %14 = vsyncpa [#allocation5], 0 }
   0x7   :  { %16 = vsyncpa [#allocation5 + $0x1], 0  ;;  %s845_s12 = smov 0   ;;  %s847_s13 = smov 0  }
   0x8   :  { %s849_s14 = smov 0   ;;  %s851_s15 = smov 0  }
   0x9   :  { %s853_s16 = smov 0   ;;  %s855_s17 = smov 0  }
   0xa   :  { %s857_s18 = smov 0   ;;  %s859_s19 = smov 0  }
   0xb LB: > { %1105 = sst [smem:[#allocation13_spill]] %s813_s18  ;;  %s884_s20 = sadd.s32 4294967295, %s817_s19   ;;  %s817_s19 = sphi %s859_s19, %s22_s19   ;;  %s813_s18 = sphi %s857_s18, %s1126_s18   ;;  %s809_s17 = sphi %s855_s17, %s1125_s17   ;;  %s805_s16 = sphi %s853_s16, %s1084_s16   ;;  %s801_s15 = sphi %s851_s15, %s1130_s15   ;;  %s797_s14 = sphi %s849_s14, %s1129_s14   ;;  %s793_s13 = sphi %s847_s13, %s1128_s13   ;;  %s789_s12 = sphi %s845_s12, %s1127_s12  }
   0xc   : > { %s497_s21 = sadd.s32 4294967294, %s817_s19   ;;  %s34_s22 = sadd.s32 1, %s813_s18 }
   0xd   : > { %p36_p0 = scmp.ge.s32.totalorder %s34_s22, 2  ;;  %p786_p1 = scmp.ne.s32.totalorder %s805_s16, 0 }
   0xe   : > { %p55_p2 = scmp.eq.s32.totalorder %s817_s19, 0  ;;  %p60_p3 = scmp.ne.s32.totalorder %s805_s16, %s801_s15 }
   0xf   : > { %s1132_s22 = smov (%p36_p0, %s34_s22), 0  ;;  %p61_p5 = scmp.eq.s32.totalorder %s884_s20, 0 }
  0x10   : > { %1106 = sst [smem:[#allocation14_spill]] %s1132_s22  ;;  %p893_p4 = por %p786_p1, %p55_p2 }
  0x11   : > { %p898_p6 = por %p61_p5, %p60_p3  ;;  %s134_s25 = ssub.s32 %s813_s18, %s1132_s22 }
  0x12   : > { %p135_p7 = scmp.eq.s32.totalorder %s134_s25, 0  ;;  %s137_s26 = sadd.s32 1, %s797_s14 }
  0x13   : > { %s1108_s24 = scalar_select %p898_p6, 1, 0 }
  0x14   : > { %s906_s27 = scalar_select %p135_p7, %s797_s14, %s137_s26  }
  0x15   : > { %p147_p8 = scmp.ne.s32.totalorder %s797_s14, %s793_s13  ;;  %p148_p9 = scmp.eq.s32.totalorder %s884_s20, 1 }
  0x16   : > { %1109 = sst [smem:[#allocation15_spill]] %s906_s27  ;;  %p153_p10 = scmp.ne.s32.totalorder %s793_s13, %s789_s12 }
  0x17   : > { %p154_p11 = scmp.eq.s32.totalorder %s497_s21, 1  ;;  %p913_p12 = por %p148_p9, %p147_p8 }
  0x18   : > { %p544_p1 = scmp.lt.s32.totalorder %s817_s19, 2  ;;  %s198_s4 = sand.u32 1, %s817_s19  }
  0x19   : > { %s1110_s28 = scalar_select %p913_p12, 1, 0 }
  0x1a   : > { %p918_p0 = por %p154_p11, %p153_p10  ;;  %p925_p2 = pnand %p544_p1, %p893_p4 }
  0x1b   : > { %s819_s5 = smov [#allocation6]   ;;  %s933_s7 = scalar_lea.sflag [#allocation7], %s198_s4 }
  0x1c   : > { %s1111_s29 = scalar_select %p918_p0, 1, 0 }
  0x1d   : > { %s1112_s30 = scalar_select %p925_p2, 1, 0 }
  0x1e   : > { %s212_s6 = sshll.u32 %s819_s5, 4  ;;  %s1113_s1 = sld [smem:[#allocation16_spill]]  ;;  %s930_s6 = int_to_ptr.vmem [resolvable:$true] %s212_s6 }
  0x1f   : > { %p943_p5 = pneg %p925_p2 }
  0x24   : > { %s620_s10 = scalar_lea.hbm %s1113_s1, 256 }
  0x25   : > { %p621_p4 = scmp.ne.s32.totalorder %s1113_s1, %s620_s10  ;;  %p627_p9 = scmp.lt.u32.totalorder %s620_s10, %s620_s10 }
  0x26   : > { %p629_p10 = scmp.lt.u32.totalorder %s620_s10, %s1113_s1 }
  0x27   : > { %p623_p7 = pnand %p943_p5, %p621_p4 }
  0x28   : > { %p630_p11 = por %p629_p10, %p627_p9 }
  0x29   : > { %p624_p8 = pneg %p623_p7 }
  0x2b   : > { %p631_p1 = pnand %p630_p11, %p624_p8 }
  0x2d   : > { %634 = shalt.err (!%p631_p1)
}
  0x2e   : > { %s635_s26 = scalar_lea.vmem %s930_s6, 256  ;;  %s642_s4 = scalar_lea.vmem %s930_s6, 512 }
  0x2f   : > { %p636_p13 = scmp.ne.s32.totalorder %s930_s6, %s635_s26  ;;  %p643_p4 = scmp.lt.s32.totalorder %s930_s6, %s930_s6 }
  0x30   : > { %p644_p7 = scmp.lt.s32.totalorder %s642_s4, %s635_s26 }
  0x31   : > { %p638_p3 = pnand %p636_p13, %p943_p5 }
  0x32   : > { %p645_p12 = por %p644_p7, %p643_p4 }
  0x33   : > { %p639_p0 = pneg %p638_p3 }
  0x35   : > { %p646_p6 = pnand %p645_p12, %p639_p0 }
  0x37   : > { %649 = shalt.err (!%p646_p6)
}
  0x38   : > { %s820_s5 = smov 128   ;;  %s821_s8 = smov 8  }
  0x39   : > { %536 = dma.hbm_to_vmem [thread:$0]  (!%p925_p2), %s1113_s1, 256, %s930_s6, %s933_s7, %s820_s5, %s820_s5, %s821_s8  }
  0x3a   : > { %p244_p13 = scmp.lt.s32.totalorder %s817_s19, 3  ;;  %p1115_p3 = scmp.ge.s32.totalorder %s817_s19, 1 }
  0x3b   : > { %s822_s15 = smov [#allocation3]   ;;  %s650_s4 = scalar_lea.hbm %s1094_s0, 256 }
  0x3c   : > { %p972_p12 = pnand %p1115_p3, %p244_p13  ;;  %s188_s23 = sshll.u32 %s822_s15, 4  ;;  %s189_s23 = int_to_ptr.vmem [resolvable:$true] %s188_s23 }
  0x3d   : > { %p651_p6 = scmp.ne.s32.totalorder %s1094_s0, %s650_s4  ;;  %p657_p9 = scmp.lt.u32.totalorder %s650_s4, %s650_s4 }
  0x3e   : > { %s1116_s11 = scalar_select %p972_p12, 1, 0 }
  0x3f   : > { %p653_p0 = pnand %p651_p6, %p943_p5  ;;  %p659_p10 = scmp.lt.u32.totalorder %s650_s4, %s1094_s0 }
  0x41   : > { %p654_p8 = pneg %p653_p0  ;;  %p660_p11 = por %p659_p10, %p657_p9 }
  0x43   : > { %p661_p1 = pnand %p660_p11, %p654_p8 }
  0x45   : > { %664 = shalt.err (!%p661_p1)
}
  0x46   : > { %s665_s10 = scalar_lea.vmem %s189_s23, 256  ;;  %s672_s15 = scalar_lea.vmem %s189_s23, 512 }
  0x47   : > { %p666_p4 = scmp.ne.s32.totalorder %s189_s23, %s665_s10  ;;  %p673_p3 = scmp.lt.s32.totalorder %s189_s23, %s189_s23 }
  0x48   : > { %p674_p12 = scmp.lt.s32.totalorder %s672_s15, %s665_s10 }
  0x49   : > { %p668_p7 = pnand %p666_p4, %p943_p5 }
  0x4a   : > { %p675_p2 = por %p674_p12, %p673_p3 }
  0x4b   : > { %p669_p13 = pneg %p668_p7 }
  0x4d   : > { %p676_p6 = pnand %p675_p2, %p669_p13 }
  0x4f   : > { %679 = shalt.err (!%p676_p6)
}
  0x50   : > { %p1117_p0 = scmp.ne.s32.totalorder %s1112_s30, 0  ;;  %s823_s25 = smov [#allocation8]  }
  0x51   : > { %s236_s26 = sshll.u32 %s823_s25, 4  ;;  %s680_s9 = scalar_lea.hbm %s1096_s2, 256  ;;  %s237_s26 = int_to_ptr.vmem [resolvable:$true] %s236_s26 }
  0x52   : > { %533 = dma.hbm_to_vmem [thread:$0]  (!%p1117_p0), %s1094_s0, 256, %s189_s23, [#allocation4], %s820_s5, %s820_s5, %s821_s8  }
  0x53   : > { %p681_p2 = scmp.ne.s32.totalorder %s1096_s2, %s680_s9  ;;  %p687_p9 = scmp.lt.u32.totalorder %s680_s9, %s680_s9 }
  0x54   : > { %p689_p10 = scmp.lt.u32.totalorder %s680_s9, %s1096_s2 }
  0x55   : > { %p683_p12 = pnand %p681_p2, %p943_p5 }
  0x56   : > { %p690_p11 = por %p689_p10, %p687_p9 }
  0x57   : > { %p684_p8 = pneg %p683_p12 }
  0x59   : > { %p691_p1 = pnand %p690_p11, %p684_p8 }
  0x5b   : > { %694 = shalt.err (!%p691_p1)
}
  0x5c   : > { %s695_s23 = scalar_lea.vmem %s237_s26, 256  ;;  %s702_s18 = scalar_lea.vmem %s237_s26, 512 }
  0x5d   : > { %p696_p4 = scmp.ne.s32.totalorder %s237_s26, %s695_s23  ;;  %p703_p3 = scmp.lt.s32.totalorder %s237_s26, %s237_s26 }
  0x5e   : > { %p704_p6 = scmp.lt.s32.totalorder %s702_s18, %s695_s23 }
  0x5f   : > { %p698_p7 = pnand %p696_p4, %p943_p5 }
  0x60   : > { %p705_p0 = por %p704_p6, %p703_p3 }
  0x61   : > { %p699_p13 = pneg %p698_p7 }
  0x63   : > { %p706_p2 = pnand %p705_p0, %p699_p13 }
  0x65   : > { %709 = shalt.err (!%p706_p2)
}
  0x66   : > { %p1118_p12 = scmp.ne.s32.totalorder %s1112_s30, 0  ;;  %p1119_p8 = scmp.ne.s32.totalorder %s1116_s11, 0 }
  0x67   : > { %s250_s21 = sand.u32 (!%p1119_p8), 1, %s805_s16   ;;  %p1120_p5 = scmp.ne.s32.totalorder (!%p1119_p8), %s1108_s24, 0 }
  0x68   : > { %539 = dma.hbm_to_vmem [thread:$0]  (!%p1118_p12), %s1096_s2, 256, %s237_s26, %s933_s7, %s820_s5, %s820_s5, %s821_s8  }
  0x69   : > { %248 = sbr.rel (%p1119_p8) target bundleno = 144 (0x90), region = 32  ;;  %s510_s22 = sshll.u32 (!%p1119_p8), %s250_s21, 4 }
  0x6a   : > { %s251_s25 = scalar_lea.sflag (!%p1119_p8), [#allocation4], %s250_s21  ;;  %s254_s4 = scalar_lea.vmem (!%p1119_p8), [#allocation3], %s510_s22 }
  0x70   : > { %775 = dma.done.wait (%p1120_p5), %s251_s25, 256  }
  0x71   : > { %777 = vsyncadd (%p1120_p5), %s251_s25, 4294967040  ;;  %s259_s30 = sand.u32 1, %s884_s20   ;;  %s263_s9 = scalar_lea.vmem [#allocation6], %s510_s22 }
  0x72   : > { %s260_s6 = scalar_lea.sflag [#allocation7], %s259_s30 }
  0x73   : > { %779 = dma.done.wait (%p1120_p5), %s260_s6, 512  }
  0x74   : > { %781 = vsyncadd (%p1120_p5), %s260_s6, 4294966784  ;;  %v342_v0 = vlaneseq  ;;  %s514_s7 = sshll.u32 %s809_s17, 4  ;;  %s302_s5 = sand.u32 1, %s793_s13   ;;  %v322_v3 = vld [vmem:[%s254_s4] sm:$0xff]  ;;  %v323_v4 = vld [vmem:[%s254_s4 + $0x8] sm:$0xff] }
  0x75   : > { %v324_v5 = vld [vmem:[%s263_s9] sm:$0xff]  ;;  %v345_v6 = vstv %s514_s7  ;;  %v325_v7 = vld [vmem:[%s263_s9 + $0x8] sm:$0xff]  ;;  %s272_s20 = scalar_lea.vmem [#allocation8], %s510_s22  ;;  %s513_s8 = sshll.u32 %s302_s5, 3 }
  0x76   : > { %v343_v1 = vshrl.u32 %v342_v0, 7  ;;  %v326_v8 = vld [vmem:[%s272_s20] sm:$0xff]  ;;  %v327_v9 = vld [vmem:[%s272_s20 + $0x8] sm:$0xff]  ;;  %s304_s24 = scalar_lea.vmem [#allocation9], %s513_s8  ;;  %s516_s26 = sshll.u32 %s809_s17, 7 }
  0x77   : > { %v328_v10 = vsub.f32 %v322_v3, %v326_v8  ;;  %v329_v11 = vsub.f32 %v323_v4, %v327_v9  ;;  %v330_v12 = vsub.f32 %v324_v5, %v326_v8  ;;  %v331_v13 = vsub.f32 %v325_v7, %v327_v9  ;;  %s375_s11 = sshll.u32 %s304_s24, 4  ;;  %s1041_s23 = scalar_lea.hbm %s1097_s3, %s516_s26  ;;  %s1036_s11 = int_to_ptr.vmem [resolvable:$true] %s375_s11 }
  0x78   : > { %v344_v2 = vadd.s32 8, %v343_v1  ;;  %v346_v14 = vadd.s32 %v345_v6, %v343_v1  ;;  %s362_s18 = scalar_lea.sflag [#allocation5], %s302_s5  ;;  %s710_s1 = scalar_lea.vmem %s1036_s11, 128 }
  0x79   : > { %v332_v16 = vmul.f32 %v328_v10, %v328_v10  ;;  %v333_v17 = vmul.f32 %v329_v11, %v329_v11  ;;  %v334_v18 = vmul.f32 %v330_v12, %v330_v12  ;;  %v335_v19 = vmul.f32 %v331_v13, %v331_v13  ;;  %p711_p0 = scmp.ne.s32.totalorder %s1036_s11, %s710_s1  ;;  %p1121_p9 = scmp.ne.s32.totalorder %s1110_s28, 0 }
  0x7a   : > { %v347_v15 = vadd.s32 %v345_v6, %v344_v2  ;;  %vm348_vm0 = vcmp.lt.s32.totalorder %v346_v14, 16  ;;  %s824_s17 = smov [#allocation9]  }
  0x7b   : > { %v336_v20 = vmul.f32 0.5, %v334_v18  ;;  %v337_v21 = vmul.f32 0.5, %v335_v19  ;;  %p712_p10 = pnand %p711_p0, %p1121_p9  ;;  %s714_s27 = sshll.u32 %s824_s17, 4  ;;  %s715_s27 = int_to_ptr.vmem [resolvable:$false] %s714_s27 }
  0x7c   : > { %vm349_vm1 = vcmp.lt.s32.totalorder %v347_v15, 16  ;;  %s716_s21 = scalar_lea.vmem %s715_s27, 256  ;;  %p717_p1 = scmp.lt.s32.totalorder %s1036_s11, %s715_s27 }
  0x7d   : > { %v338_v22 = vadd.f32 %v336_v20, %v332_v16  ;;  %v339_v23 = vadd.f32 %v337_v21, %v333_v17  ;;  %p713_p11 = pneg %p712_p10  ;;  %p718_p4 = scmp.lt.s32.totalorder %s716_s21, %s710_s1 }
  0x7f   : > { %v350_v24 = vsel %vm348_vm0, %v338_v22, 0.0  ;;  %v351_v25 = vsel %vm349_vm1, %v339_v23, 0.0  ;;  %p719_p7 = por %p718_p4, %p717_p1 }
  0x80   : > { %v353_v26 = vadd.f32 %v351_v25, %v350_v24 }
  0x81   : > { %p720_p13 = pnand %p719_p7, %p713_p11 }
  0x82   : > { %360 = vst [vmem:[%s304_s24] sm:$0xff] %v353_v26 }
  0x83   : > { %723 = shalt.err (!%p720_p13)
}
  0x84   : > { %s724_s22 = scalar_lea.hbm %s1041_s23, 128  ;;  %s728_s30 = scalar_lea.hbm %s1097_s3, 256 }
  0x85   : > { %p725_p3 = scmp.ne.s32.totalorder %s1041_s23, %s724_s22  ;;  %p729_p12 = scmp.lt.u32.totalorder %s1041_s23, %s1097_s3 }
  0x86   : > { %p730_p8 = scmp.lt.u32.totalorder %s728_s30, %s724_s22  ;;  %p732_p0 = scmp.lt.u32.totalorder %s724_s22, %s1041_s23 }
  0x87   : > { %p726_p6 = pnand %p725_p3, %p1121_p9 }
  0x88   : > { %p731_p5 = por %p730_p8, %p729_p12 }
  0x89   : > { %p727_p2 = pneg %p726_p6 }
  0x8a   : > { %p733_p10 = por %p732_p0, %p731_p5 }
  0x8c   : > { %p734_p11 = pnand %p733_p10, %p727_p2 }
  0x8e   : > { %737 = shalt.err (!%p734_p11)
}
  0x8f   : > { %528 = dma.vmem_to_hbm [thread:$0]  (%p1121_p9), %s1036_s11, 128, %s1041_s23, %s362_s18  }
  0x90 PF: > { %s387_s7 = sand.u32 1, %s789_s12   ;;  %p1122_p1 = scmp.ne.s32.totalorder %s1111_s29, 0 }
  0x91   : > { %p1123_p4 = scmp.ge.s32.totalorder %s817_s19, 2  ;;  %s388_s5 = scalar_lea.sflag [#allocation5], %s387_s7 }
  0x93   : > { %p541_p7 = pnand %p1123_p4, %p1122_p1 }
  0x95   : > { %783 = dma.done.wait (!%p541_p7), %s388_s5, 128  }
  0x96   : > { %785 = vsyncadd (!%p541_p7), %s388_s5, 4294967168  ;;  %s22_s19 = sadd.s32 1, %s817_s19   ;;  %s1124_s28 = sld [smem:[#allocation15_spill]] }
  0x97   : > { %p19_p13 = scmp.ge.s32.totalorder %s22_s19, 4   ;;  %s1125_s17 = sld [smem:[#allocation13_spill]] }
  0x98   : > { %s1126_s18 = sld [smem:[#allocation14_spill]]  ;;  %s1127_s12 = smov %s793_s13 }
  0x99   : > { %s1128_s13 = smov %s797_s14  ;;  %s1130_s15 = smov %s805_s16 }
  0x9a   : > { %s1084_s16 = smov 0   ;;  %21 = sbr.rel (!%p19_p13) target bundleno = 11 (0xb), region = 109 }
  0x9c   : > { %s1129_s14 = smov %s1124_s28 }
  0xa1   :  { %393 = vsyncpa [#allocation4], 1 }
  0xa2   :  { %395 = vsyncpa [#allocation4 + $0x1], 1 }
  0xa3   :  { %396 = vsyncpa [#allocation7], 1 }
  0xa4   :  { %398 = vsyncpa [#allocation7 + $0x1], 1 }
  0xa5   :  { %399 = vsyncpa [#allocation5], 1 }
  0xa6   :  { %401 = vsyncpa [#allocation5 + $0x1], 1 }

</bundles_post_ra>
